<compile_context>
chip_gen: v7x
topology: tpu7x:2x2x1
jax: 0.10.0
libtpu: 0.0.40
codegen_flags: <defaults>
</compile_context>

<pallas_src>
import functools

import jax
import jax.numpy as jnp
from jax.experimental import pallas as pl
from jax.experimental.pallas import tpu as pltpu


def _unet_block_kernel(x_ref, w1_ref, b1_ref, w2_ref, b2_ref, out_ref,
                       xs1_ref, xs2_ref, *, H):
    """Fused (conv3x3 + bias + ReLU) x2 for one batch tile.

    Layouts (channels folded onto the lane axis, rows = (b, h) flattened):
      x_ref  : (B*H, W*Cin)         f32   input tile
      w1_ref : (3*W*Cin,  W*Cout)   bf16  banded im2col weight, stage 1
      b1_ref : (1, W*Cout)          f32   bias tiled over W
      w2_ref : (3*W*Cout, W*Cout)   bf16  banded im2col weight, stage 2
      b2_ref : (1, W*Cout)          f32
      out_ref: (B*H, W*Cout)        f32   lane-dense output tile
      xs1_ref: VMEM (B*H, 3*W*Cin)  bf16  stage-1 im2col scratch
      xs2_ref: VMEM (B*H, 3*W*Cout) bf16  stage-2 im2col scratch
    """

    def im2col_rows(v, xs_ref):
        """Write [row h-1 | row h | row h+1] of v (zero at image top/bottom)
        into xs_ref as bf16.  Every element of xs_ref is rewritten on every
        call, so there is no cross-step scratch state."""
        wc = v.shape[1]
        row = jax.lax.broadcasted_iota(jnp.int32, v.shape, 0)
        h = row % H                      # row index within its image
        up = jnp.roll(v, 1, axis=0)      # up[m] = v[m-1]  (wrap fixed by mask)
        dn = jnp.roll(v, -1, axis=0)     # dn[m] = v[m+1]
        # The masks implement the vertical SAME zero-padding AND stop rows
        # bleeding across images inside the batch tile.
        seg0 = jnp.where(h == 0, 0.0, up)
        seg2 = jnp.where(h == H - 1, 0.0, dn)
        xs_ref[:, 0 * wc:1 * wc] = seg0.astype(jnp.bfloat16)
        xs_ref[:, 1 * wc:2 * wc] = v.astype(jnp.bfloat16)
        xs_ref[:, 2 * wc:3 * wc] = seg2.astype(jnp.bfloat16)

    # ---- stage 1: 3x3 conv as one MXU dot (K = 3*W*Cin), bias + ReLU in f32.
    im2col_rows(x_ref[...].astype(jnp.float32), xs1_ref)
    y1 = jnp.dot(xs1_ref[...], w1_ref[...], preferred_element_type=jnp.float32)
    y1 = jnp.maximum(y1 + b1_ref[...], 0.0)

    # ---- stage 2: intermediate activation never leaves VMEM.
    im2col_rows(y1, xs2_ref)
    y2 = jnp.dot(xs2_ref[...], w2_ref[...], preferred_element_type=jnp.float32)
    y2 = jnp.maximum(y2 + b2_ref[...], 0.0)

    out_ref[...] = y2.astype(out_ref.dtype)


def _banded_weight(w, W):
    """HWIO (3,3,Cin,Cout) -> im2col weight of shape (3*W*Cin, W*Cout).

    band[(dy*W + w_in)*Cin + ci, w*Cout + co] = w[dy, w_in - w + 1, ci, co]
    when |w_in - w| <= 1, else 0.  Horizontal SAME zero-padding is folded into
    the band's structural zeros, so the kernel needs no lane halo.
    """
    kh, kw, Cin, Cout = w.shape
    win = jnp.arange(W)
    wout = jnp.arange(W)
    dx = jnp.arange(kw)
    sel = (win[:, None, None] == wout[None, :, None] + dx[None, None, :] - 1)
    sel = sel.astype(w.dtype)                       # (W, W, 3): [w_in, w, dx]
    band = jnp.einsum('iwd,kdcf->kicwf', sel, w)    # (3, W, Cin, W, Cout)
    return band.reshape(kh * W * Cin, W * Cout)


def center_crop_nchw(x, size):
    """torchvision.transforms.CenterCrop semantics for NCHW input."""
    H, W = x.shape[-2], x.shape[-1]
    t = int(round((H - size) / 2.0))
    l = int(round((W - size) / 2.0))
    return x[..., t:t + size, l:l + size]


@functools.partial(jax.jit, static_argnames=("cout", "crop_size", "batch_tile"))
def unet_conv_block_fused(x_nchw, wb1, b1t, wb2, b2t, *, cout, crop_size,
                          batch_tile):
    """x: (N,Cin,H,W) -> (x_out (N,Cout,H,W), crop (N,Cout,crop,crop))."""
    N, cin, H, W = x_nchw.shape
    assert N % batch_tile == 0
    BH = batch_tile * H

    # NCHW -> flat (N*H, W*Cin): channels live on the lane axis.
    # TODO(synk): in a full UNet, make this flat layout the canonical
    # inter-layer activation layout so the two transposes (full HBM round
    # trips) disappear from every block.
    x_flat = jnp.transpose(x_nchw, (0, 2, 3, 1)).reshape(N * H, W * cin)

    out_flat = pl.pallas_call(
        functools.partial(_unet_block_kernel, H=H),
        out_shape=jax.ShapeDtypeStruct((N * H, W * cout), x_nchw.dtype),
        grid_spec=pltpu.PrefetchScalarGridSpec(
            num_scalar_prefetch=0,
            # One step processes `batch_tile` images (M = batch_tile*H rows of
            # MXU work per dot).  Grid steps are fully independent (scratch is
            # rewritten each step), so "parallel" is safe on v7x's 2 cores.
            grid=(N // batch_tile,),
            in_specs=[
                pl.BlockSpec((BH, W * cin), lambda n: (n, 0)),
                pl.BlockSpec((3 * W * cin, W * cout), lambda n: (0, 0)),
                pl.BlockSpec((1, W * cout), lambda n: (0, 0)),
                pl.BlockSpec((3 * W * cout, W * cout), lambda n: (0, 0)),
                pl.BlockSpec((1, W * cout), lambda n: (0, 0)),
            ],
            out_specs=pl.BlockSpec((BH, W * cout), lambda n: (n, 0)),
            scratch_shapes=[
                pltpu.VMEM((BH, 3 * W * cin), jnp.bfloat16),
                pltpu.VMEM((BH, 3 * W * cout), jnp.bfloat16),
            ],
        ),
        compiler_params=pltpu.CompilerParams(
            dimension_semantics=("parallel",)),
    )(x_flat, wb1, b1t, wb2, b2t)

    x_out = out_flat.reshape(N, H, W, cout).transpose(0, 3, 1, 2)
    crop = center_crop_nchw(x_out, crop_size)
    return x_out, crop


class UNetConvBlockPallas:
    """JAX/Pallas counterpart of the PyTorch UNetConvBlock."""

    def __init__(self, crop_size, in_channels, out_channels, key):
        self.crop_size = crop_size
        self.cin = in_channels
        self.cout = out_channels
        k1, k2, k3, k4 = jax.random.split(key, 4)
        lim1 = 1.0 / float(jnp.sqrt(in_channels * 9.0))
        lim2 = 1.0 / float(jnp.sqrt(out_channels * 9.0))
        # Deterministic synthetic init (PyTorch-like uniform fan-in scaling),
        # weights stored HWIO: (3, 3, Cin, Cout).
        self.w1 = jax.random.uniform(k1, (3, 3, in_channels, out_channels),
                                     jnp.float32, -lim1, lim1)
        self.b1 = jax.random.uniform(k2, (out_channels,), jnp.float32,
                                     -lim1, lim1)
        self.w2 = jax.random.uniform(k3, (3, 3, out_channels, out_channels),
                                     jnp.float32, -lim2, lim2)
        self.b2 = jax.random.uniform(k4, (out_channels,), jnp.float32,
                                     -lim2, lim2)
        self._packed_cache = {}

    def _packed(self, W):
        # Banded weights / tiled biases are built once per width and cached
        # (no per-forward banding / tiling work, per the review).
        if W not in self._packed_cache:
            wb1 = _banded_weight(self.w1, W).astype(jnp.bfloat16)
            wb2 = _banded_weight(self.w2, W).astype(jnp.bfloat16)
            b1t = jnp.tile(self.b1, W).reshape(1, W * self.cout)
            b2t = jnp.tile(self.b2, W).reshape(1, W * self.cout)
            self._packed_cache[W] = tuple(
                jax.block_until_ready(a) for a in (wb1, b1t, wb2, b2t))
        return self._packed_cache[W]

    def __call__(self, x_nchw):
        N, _, _, W = x_nchw.shape
        wb1, b1t, wb2, b2t = self._packed(W)
        return unet_conv_block_fused(
            x_nchw, wb1, b1t, wb2, b2t,
            cout=self.cout, crop_size=self.crop_size,
            batch_tile=N)  # fold the whole (small) batch into one grid step


def _reference(x_nchw, block):
    """Pure-JAX reference mirroring the kernel's bf16 input/weight rounding."""
    def conv(x, w, b):
        y = jax.lax.conv_general_dilated(
            x.astype(jnp.bfloat16), w.astype(jnp.bfloat16),
            window_strides=(1, 1), padding="SAME",
            dimension_numbers=("NCHW", "HWIO", "NCHW"),
            preferred_element_type=jnp.float32)
        return jax.nn.relu(y + b.reshape(1, -1, 1, 1))
    y = conv(x_nchw, block.w1, block.b1)
    y = conv(y, block.w2, block.b2)
    return y, center_crop_nchw(y, block.crop_size)


if __name__ == "__main__":
    key = jax.random.PRNGKey(0)
    k_in, k_par = jax.random.split(key)

    N, Cin, Cout, H, W, crop_size = 2, 4, 8, 16, 16, 8
    x = jax.random.normal(k_in, (N, Cin, H, W), jnp.float32)

    block = UNetConvBlockPallas(crop_size, Cin, Cout, k_par)

    out, cropped = block(x)
    out = jax.block_until_ready(out)
    cropped = jax.block_until_ready(cropped)

    assert out.shape == (N, Cout, H, W)
    assert cropped.shape == (N, Cout, crop_size, crop_size)

    ref_out, ref_crop = _reference(x, block)
    # Both sides consume bf16 activations/weights with f32 accumulation; only
    # the f32 summation order differs.
    assert jnp.allclose(out, ref_out, atol=2e-3, rtol=2e-3), float(
        jnp.max(jnp.abs(out - ref_out)))
    assert jnp.allclose(cropped, ref_crop, atol=2e-3, rtol=2e-3)

    print("KERNEL_OK")
</pallas_src>

<mosaic_0001>
module attributes {stable_mosaic.version = 11 : i64} {
  func.func @_unet_block_kernel(%arg0: i32, %arg1: memref<32x64xf32, #tpu.memory_space<vmem>>, %arg2: memref<192x128xbf16, #tpu.memory_space<vmem>>, %arg3: memref<1x128xf32, #tpu.memory_space<vmem>>, %arg4: memref<384x128xbf16, #tpu.memory_space<vmem>>, %arg5: memref<1x128xf32, #tpu.memory_space<vmem>>, %arg6: memref<32x128xf32, #tpu.memory_space<vmem>>, %arg7: memref<32x192xbf16, #tpu.memory_space<vmem>>, %arg8: memref<32x384xbf16, #tpu.memory_space<vmem>>) attributes {dimension_semantics = [#tpu.dimension_semantics<parallel>], iteration_bounds = array<i64: 1>, scalar_prefetch = 0 : i64, scratch_operands = 2 : i64, tpu.core_type = #tpu.core_type<tc>, window_params = [{transform_indices = @transform_0, window_bounds = array<i64: 32, 64>}, {pipeline_mode = #tpu.pipeline_mode<synchronous>, transform_indices = @transform_1, window_bounds = array<i64: 192, 128>}, {pipeline_mode = #tpu.pipeline_mode<synchronous>, transform_indices = @transform_2, window_bounds = array<i64: 1, 128>}, {pipeline_mode = #tpu.pipeline_mode<synchronous>, transform_indices = @transform_3, window_bounds = array<i64: 384, 128>}, {pipeline_mode = #tpu.pipeline_mode<synchronous>, transform_indices = @transform_4, window_bounds = array<i64: 1, 128>}, {transform_indices = @transform_5, window_bounds = array<i64: 32, 128>}]} {
    %c0 = arith.constant 0 : index
    %c0_0 = arith.constant 0 : index
    %0 = vector.load %arg1[%c0, %c0_0] : memref<32x64xf32, #tpu.memory_space<vmem>>, vector<32x64xf32>
    %1 = tpu.iota {dimensions = array<i32: 0>} : vector<32x64xi32>
    %c16_i32 = arith.constant 16 : i32
    %c0_i32 = arith.constant 0 : i32
    %2 = arith.cmpi eq, %c16_i32, %c0_i32 : i32
    %c1_i32 = arith.constant 1 : i32
    %3 = arith.select %2, %c1_i32, %c16_i32 : i32
    %4 = vector.broadcast %3 : i32 to vector<32x64xi32>
    %5 = arith.remsi %1, %4 : vector<32x64xi32>
    %c0_i32_1 = arith.constant 0 : i32
    %6 = vector.broadcast %c0_i32_1 : i32 to vector<32x64xi32>
    %7 = arith.cmpi ne, %5, %6 : vector<32x64xi32>
    %c0_i32_2 = arith.constant 0 : i32
    %8 = vector.broadcast %c0_i32_2 : i32 to vector<32x64xi32>
    %9 = arith.cmpi slt, %5, %8 : vector<32x64xi32>
    %c0_i32_3 = arith.constant 0 : i32
    %10 = arith.cmpi slt, %3, %c0_i32_3 : i32
    %11 = vector.broadcast %10 : i1 to vector<32x64xi1>
    %12 = vector.broadcast %11 : vector<32x64xi1> to vector<32x64xi1>
    %13 = arith.xori %9, %12 : vector<32x64xi1>
    %14 = arith.andi %13, %7 : vector<32x64xi1>
    %15 = vector.broadcast %3 : i32 to vector<32x64xi32>
    %16 = arith.addi %5, %15 : vector<32x64xi32>
    %17 = arith.select %14, %16, %5 : vector<32x64xi1>, vector<32x64xi32>
    %18 = vector.extract_strided_slice %0 {offsets = [31, 0], sizes = [1, 64], strides = [1, 1]} : vector<32x64xf32> to vector<1x64xf32>
    %19 = vector.extract_strided_slice %0 {offsets = [0, 0], sizes = [31, 64], strides = [1, 1]} : vector<32x64xf32> to vector<31x64xf32>
    %20 = tpu.concatenate %18, %19 in 0 : vector<1x64xf32>, vector<31x64xf32> -> vector<32x64xf32>
    %21 = vector.extract_strided_slice %0 {offsets = [1, 0], sizes = [31, 64], strides = [1, 1]} : vector<32x64xf32> to vector<31x64xf32>
    %22 = vector.extract_strided_slice %0 {offsets = [0, 0], sizes = [1, 64], strides = [1, 1]} : vector<32x64xf32> to vector<1x64xf32>
    %23 = tpu.concatenate %21, %22 in 0 : vector<31x64xf32>, vector<1x64xf32> -> vector<32x64xf32>
    %c0_i32_4 = arith.constant 0 : i32
    %24 = vector.broadcast %c0_i32_4 : i32 to vector<32x64xi32>
    %25 = arith.cmpi eq, %17, %24 : vector<32x64xi32>
    %cst = arith.constant 0.000000e+00 : f32
    %26 = vector.broadcast %cst : f32 to vector<32x64xf32>
    %27 = arith.select %25, %26, %20 : vector<32x64xi1>, vector<32x64xf32>
    %c15_i32 = arith.constant 15 : i32
    %28 = vector.broadcast %c15_i32 : i32 to vector<32x64xi32>
    %29 = arith.cmpi eq, %17, %28 : vector<32x64xi32>
    %cst_5 = arith.constant 0.000000e+00 : f32
    %30 = vector.broadcast %cst_5 : f32 to vector<32x64xf32>
    %31 = arith.select %29, %30, %23 : vector<32x64xi1>, vector<32x64xf32>
    %32 = arith.truncf %27 : vector<32x64xf32> to vector<32x64xbf16>
    %c0_6 = arith.constant 0 : index
    %c0_7 = arith.constant 0 : index
    %33 = vector.load %arg7[%c0_6, %c0_7] : memref<32x192xbf16, #tpu.memory_space<vmem>>, vector<32x64xbf16>
    tpu.vector_store %arg7[%c0_6, %c0_7], %32 {strides = array<i32>} : memref<32x192xbf16, #tpu.memory_space<vmem>>, vector<32x64xbf16>,
    %34 = arith.truncf %0 : vector<32x64xf32> to vector<32x64xbf16>
    %c0_8 = arith.constant 0 : index
    %c64 = arith.constant 64 : index
    %35 = vector.load %arg7[%c0_8, %c64] : memref<32x192xbf16, #tpu.memory_space<vmem>>, vector<32x64xbf16>
    tpu.vector_store %arg7[%c0_8, %c64], %34 {strides = array<i32>} : memref<32x192xbf16, #tpu.memory_space<vmem>>, vector<32x64xbf16>,
    %36 = arith.truncf %31 : vector<32x64xf32> to vector<32x64xbf16>
    %c0_9 = arith.constant 0 : index
    %c128 = arith.constant 128 : index
    %37 = vector.load %arg7[%c0_9, %c128] : memref<32x192xbf16, #tpu.memory_space<vmem>>, vector<32x64xbf16>
    tpu.vector_store %arg7[%c0_9, %c128], %36 {strides = array<i32>} : memref<32x192xbf16, #tpu.memory_space<vmem>>, vector<32x64xbf16>,
    %c0_10 = arith.constant 0 : index
    %c0_11 = arith.constant 0 : index
    %38 = vector.load %arg7[%c0_10, %c0_11] : memref<32x192xbf16, #tpu.memory_space<vmem>>, vector<32x192xbf16>
    %c0_12 = arith.constant 0 : index
    %c0_13 = arith.constant 0 : index
    %39 = vector.load %arg2[%c0_12, %c0_13] : memref<192x128xbf16, #tpu.memory_space<vmem>>, vector<192x128xbf16>
    %cst_14 = arith.constant dense<0.000000e+00> : vector<32x128xf32>
    %40 = tpu.matmul %38, %39, %cst_14 {dimension_numbers = #tpu.dot_dimension_numbers<[1], [0], [0], [1], [0, 0, 1, 1], [], []>} : vector<32x192xbf16>, vector<192x128xbf16>, vector<32x128xf32> -> vector<32x128xf32>
    %c0_15 = arith.constant 0 : index
    %c0_16 = arith.constant 0 : index
    %41 = vector.load %arg3[%c0_15, %c0_16] : memref<1x128xf32, #tpu.memory_space<vmem>>, vector<1x128xf32>
    %42 = vector.broadcast %41 : vector<1x128xf32> to vector<32x128xf32>
    %43 = arith.addf %40, %42 : vector<32x128xf32>
    %cst_17 = arith.constant 0.000000e+00 : f32
    %44 = vector.broadcast %cst_17 : f32 to vector<32x128xf32>
    %45 = arith.maximumf %43, %44 : vector<32x128xf32>
    %46 = tpu.iota {dimensions = array<i32: 0>} : vector<32x128xi32>
    %c16_i32_18 = arith.constant 16 : i32
    %c0_i32_19 = arith.constant 0 : i32
    %47 = arith.cmpi eq, %c16_i32_18, %c0_i32_19 : i32
    %c1_i32_20 = arith.constant 1 : i32
    %48 = arith.select %47, %c1_i32_20, %c16_i32_18 : i32
    %49 = vector.broadcast %48 : i32 to vector<32x128xi32>
    %50 = arith.remsi %46, %49 : vector<32x128xi32>
    %c0_i32_21 = arith.constant 0 : i32
    %51 = vector.broadcast %c0_i32_21 : i32 to vector<32x128xi32>
    %52 = arith.cmpi ne, %50, %51 : vector<32x128xi32>
    %c0_i32_22 = arith.constant 0 : i32
    %53 = vector.broadcast %c0_i32_22 : i32 to vector<32x128xi32>
    %54 = arith.cmpi slt, %50, %53 : vector<32x128xi32>
    %c0_i32_23 = arith.constant 0 : i32
    %55 = arith.cmpi slt, %48, %c0_i32_23 : i32
    %56 = vector.broadcast %55 : i1 to vector<32x128xi1>
    %57 = vector.broadcast %56 : vector<32x128xi1> to vector<32x128xi1>
    %58 = arith.xori %54, %57 : vector<32x128xi1>
    %59 = arith.andi %58, %52 : vector<32x128xi1>
    %60 = vector.broadcast %48 : i32 to vector<32x128xi32>
    %61 = arith.addi %50, %60 : vector<32x128xi32>
    %62 = arith.select %59, %61, %50 : vector<32x128xi1>, vector<32x128xi32>
    %63 = vector.extract_strided_slice %45 {offsets = [31, 0], sizes = [1, 128], strides = [1, 1]} : vector<32x128xf32> to vector<1x128xf32>
    %64 = vector.extract_strided_slice %45 {offsets = [0, 0], sizes = [31, 128], strides = [1, 1]} : vector<32x128xf32> to vector<31x128xf32>
    %65 = tpu.concatenate %63, %64 in 0 : vector<1x128xf32>, vector<31x128xf32> -> vector<32x128xf32>
    %66 = vector.extract_strided_slice %45 {offsets = [1, 0], sizes = [31, 128], strides = [1, 1]} : vector<32x128xf32> to vector<31x128xf32>
    %67 = vector.extract_strided_slice %45 {offsets = [0, 0], sizes = [1, 128], strides = [1, 1]} : vector<32x128xf32> to vector<1x128xf32>
    %68 = tpu.concatenate %66, %67 in 0 : vector<31x128xf32>, vector<1x128xf32> -> vector<32x128xf32>
    %c0_i32_24 = arith.constant 0 : i32
    %69 = vector.broadcast %c0_i32_24 : i32 to vector<32x128xi32>
    %70 = arith.cmpi eq, %62, %69 : vector<32x128xi32>
    %cst_25 = arith.constant 0.000000e+00 : f32
    %71 = vector.broadcast %cst_25 : f32 to vector<32x128xf32>
    %72 = arith.select %70, %71, %65 : vector<32x128xi1>, vector<32x128xf32>
    %c15_i32_26 = arith.constant 15 : i32
    %73 = vector.broadcast %c15_i32_26 : i32 to vector<32x128xi32>
    %74 = arith.cmpi eq, %62, %73 : vector<32x128xi32>
    %cst_27 = arith.constant 0.000000e+00 : f32
    %75 = vector.broadcast %cst_27 : f32 to vector<32x128xf32>
    %76 = arith.select %74, %75, %68 : vector<32x128xi1>, vector<32x128xf32>
    %77 = arith.truncf %72 : vector<32x128xf32> to vector<32x128xbf16>
    %c0_28 = arith.constant 0 : index
    %c0_29 = arith.constant 0 : index
    %78 = vector.load %arg8[%c0_28, %c0_29] : memref<32x384xbf16, #tpu.memory_space<vmem>>, vector<32x128xbf16>
    tpu.vector_store %arg8[%c0_28, %c0_29], %77 {strides = array<i32>} : memref<32x384xbf16, #tpu.memory_space<vmem>>, vector<32x128xbf16>,
    %79 = arith.truncf %45 : vector<32x128xf32> to vector<32x128xbf16>
    %c0_30 = arith.constant 0 : index
    %c128_31 = arith.constant 128 : index
    %80 = vector.load %arg8[%c0_30, %c128_31] : memref<32x384xbf16, #tpu.memory_space<vmem>>, vector<32x128xbf16>
    tpu.vector_store %arg8[%c0_30, %c128_31], %79 {strides = array<i32>} : memref<32x384xbf16, #tpu.memory_space<vmem>>, vector<32x128xbf16>,
    %81 = arith.truncf %76 : vector<32x128xf32> to vector<32x128xbf16>
    %c0_32 = arith.constant 0 : index
    %c256 = arith.constant 256 : index
    %82 = vector.load %arg8[%c0_32, %c256] : memref<32x384xbf16, #tpu.memory_space<vmem>>, vector<32x128xbf16>
    tpu.vector_store %arg8[%c0_32, %c256], %81 {strides = array<i32>} : memref<32x384xbf16, #tpu.memory_space<vmem>>, vector<32x128xbf16>,
    %c0_33 = arith.constant 0 : index
    %c0_34 = arith.constant 0 : index
    %83 = vector.load %arg8[%c0_33, %c0_34] : memref<32x384xbf16, #tpu.memory_space<vmem>>, vector<32x384xbf16>
    %c0_35 = arith.constant 0 : index
    %c0_36 = arith.constant 0 : index
    %84 = vector.load %arg4[%c0_35, %c0_36] : memref<384x128xbf16, #tpu.memory_space<vmem>>, vector<384x128xbf16>
    %cst_37 = arith.constant dense<0.000000e+00> : vector<32x128xf32>
    %85 = tpu.matmul %83, %84, %cst_37 {dimension_numbers = #tpu.dot_dimension_numbers<[1], [0], [0], [1], [0, 0, 1, 1], [], []>} : vector<32x384xbf16>, vector<384x128xbf16>, vector<32x128xf32> -> vector<32x128xf32>
    %c0_38 = arith.constant 0 : index
    %c0_39 = arith.constant 0 : index
    %86 = vector.load %arg5[%c0_38, %c0_39] : memref<1x128xf32, #tpu.memory_space<vmem>>, vector<1x128xf32>
    %87 = vector.broadcast %86 : vector<1x128xf32> to vector<32x128xf32>
    %88 = arith.addf %85, %87 : vector<32x128xf32>
    %cst_40 = arith.constant 0.000000e+00 : f32
    %89 = vector.broadcast %cst_40 : f32 to vector<32x128xf32>
    %90 = arith.maximumf %88, %89 : vector<32x128xf32>
    %c0_41 = arith.constant 0 : index
    %c0_42 = arith.constant 0 : index
    %91 = vector.load %arg6[%c0_41, %c0_42] : memref<32x128xf32, #tpu.memory_space<vmem>>, vector<32x128xf32>
    tpu.vector_store %arg6[%c0_41, %c0_42], %90 {strides = array<i32>} : memref<32x128xf32, #tpu.memory_space<vmem>>, vector<32x128xf32>,
    return
  }
  func.func @transform_0(%arg0: i32) -> (i32, i32) {
    %c0_i32 = arith.constant 0 : i32
    %c0_i32_0 = arith.constant 0 : i32
    return %arg0, %c0_i32 : i32, i32
  }
  func.func @transform_1(%arg0: i32) -> (i32, i32) {
    %c0_i32 = arith.constant 0 : i32
    %c0_i32_0 = arith.constant 0 : i32
    %c0_i32_1 = arith.constant 0 : i32
    return %c0_i32, %c0_i32_0 : i32, i32
  }
  func.func @transform_2(%arg0: i32) -> (i32, i32) {
    %c0_i32 = arith.constant 0 : i32
    %c0_i32_0 = arith.constant 0 : i32
    %c0_i32_1 = arith.constant 0 : i32
    return %c0_i32, %c0_i32_0 : i32, i32
  }
  func.func @transform_3(%arg0: i32) -> (i32, i32) {
    %c0_i32 = arith.constant 0 : i32
    %c0_i32_0 = arith.constant 0 : i32
    %c0_i32_1 = arith.constant 0 : i32
    return %c0_i32, %c0_i32_0 : i32, i32
  }
  func.func @transform_4(%arg0: i32) -> (i32, i32) {
    %c0_i32 = arith.constant 0 : i32
    %c0_i32_0 = arith.constant 0 : i32
    %c0_i32_1 = arith.constant 0 : i32
    return %c0_i32, %c0_i32_0 : i32, i32
  }
  func.func @transform_5(%arg0: i32) -> (i32, i32) {
    %c0_i32 = arith.constant 0 : i32
    %c0_i32_0 = arith.constant 0 : i32
    return %arg0, %c0_i32 : i32, i32
  }
}

</mosaic_0001>

<bundles_post_ra>
// kernel: unet_conv_block_fused.1
= control target key start
LH: loop header
LB: loop body
LE: loop exit
PB: predicated region body
PF: predicated region fallthrough
CT: control target
= control target key end

     0   :  { %v25_v0 = vlaneseq  ;;  %v832_v4 = vmov 0   ;;  %vm96_vm0 = vcmask 1046528   ;;  %vm84_vm1 = vcmask 1040384   ;;  %s833_s26 = smov 64   ;;  %s1073_s0 = inlined_call_operand.vmem [shape: f32[32,64], index: 0, kind: input, shape index: {}]   ;;  %s1074_s1 = inlined_call_operand.vmem [shape: bf16[192,128], index: 1, kind: input, shape index: {}]   ;;  %s1075_s3 = inlined_call_operand.vmem [shape: bf16[384,128], index: 3, kind: input, shape index: {}]   ;;  %s1076_s2 = inlined_call_operand.vmem [shape: f32[1,128], index: 2, kind: input, shape index: {}]   ;;  %s1077_s4 = inlined_call_operand.vmem [shape: f32[1,128], index: 4, kind: input, shape index: {}]   ;;  %s1078_s5 = inlined_call_operand.vmem [shape: f32[32,128], index: 5, kind: output, shape index: {}]  }
   0x1   :  { %v21_v1 = vld [vmem:[%s1073_s0] sm:$0xff]  ;;  %v22_v2 = vld [vmem:[%s1073_s0 + $0x8] sm:$0xff]  ;;  %v23_v3 = vld [vmem:[%s1073_s0 + $0x10] sm:$0xff]  ;;  %261 = vmatprep.subr.bf16.mxu0 %v832_v4  ;;  %vm128_vm4 = vcmask 523264   ;;  %vm141_vm7 = vcmask 1048064   ;;  %vm834_vm9 = vmmov 1  }
   0x2   :  { %v98_v5 = vrot.slane %v22_v2, 1  ;;  %v131_v6 = vpack.c.bf16 %v22_v2, %v21_v1  ;;  %v24_v7 = vld [vmem:[%s1073_s0 + $0x18] sm:$0xff]  ;;  %v85_v8 = vrot.slane %v21_v1, 7  ;;  %v97_v9 = vrot.slane %v21_v1, 1  ;;  %v796_v15 = vld [vmem:[%s1074_s1] sm:$0xff]   ;;  %v797_v20 = vld [vmem:[%s1074_s1 + $0x8] sm:$0xff]  }
   0x3   :  { %v26_v10 = vshrl.u32 %v25_v0, 7  ;;  %v79_v11 = vrot.slane %v24_v7, 7  ;;  %v100_v12 = vrot.slane %v23_v3, 1  ;;  %v102_v13 = vrot.slane %v24_v7, 1  ;;  %262 = vmatpush1.bf16.msra.mxu0 %v796_v15  ;;  %v798_v29 = vld [vmem:[%s1074_s1 + $0x10] sm:$0xff]   ;;  %v799_v41 = vld [vmem:[%s1074_s1 + $0x18] sm:$0xff]  }
   0x4   :  { %135 = vrot.lane.b32.xlu0 %v131_v6, %s833_s26  ;;  %v132_v14 = vpack.c.bf16 %v24_v7, %v23_v3  ;;  %v86_v18 = vrot.slane %v22_v2, 7  ;;  %263 = vmatprep.subr.bf16.mxu0 %v832_v4  ;;  %v99_v25 = vsel %vm96_vm0, %v97_v9, %v98_v5  ;;  %v88_v34 = vrot.slane %v23_v3, 7  ;;  %v800_v44 = vld [vmem:[%s1074_s1 + $0x20] sm:$0xff]   ;;  %v810_v50 = vld [vmem:[%s1075_s3 + $0x48] sm:$0xff]   ;;  %v812_v54 = vld [vmem:[%s1075_s3 + $0x50] sm:$0xff]  }
   0x5   :  { %v27_v16 = vadd.s32 8, %v26_v10  ;;  %v29_v17 = vadd.s32 24, %v26_v10  ;;  %v101_v19 = vsel %vm96_vm0, %v98_v5, %v100_v12  ;;  %v109_v23 = vsel %vm96_vm0, %v102_v13, %v97_v9  ;;  %v808_v46 = vld [vmem:[%s1075_s3 + $0x40] sm:$0xff]   ;;  %v811_v52 = vld [vmem:[%s1075_s3 + $0x8] sm:$0xff]   ;;  %v813_v56 = vld [vmem:[%s1075_s3 + $0x10] sm:$0xff]  }
   0x6   :  { %v34_v24 = vand.u32 15, %v26_v10  ;;  %v103_v26 = vsel %vm96_vm0, %v100_v12, %v102_v13  ;;  %v95_v30 = vsel %vm84_vm1, %v79_v11, %v85_v8  ;;  %v87_v33 = vsel %vm84_vm1, %v85_v8, %v86_v18  ;;  %v809_v48 = vld [vmem:[%s1075_s3] sm:$0xff]   ;;  %735 = vmatprep.subr.bf16.mxu1 %v808_v46  ;;  %v801_v55 = vld [vmem:[%s1074_s1 + $0x28] sm:$0xff]   ;;  %v814_v57 = vld [vmem:[%s1075_s3 + $0x58] sm:$0xff]  }
   0x7   :  { %v41_v21 = vand.u32 15, %v27_v16  ;;  %v55_v22 = vand.u32 15, %v29_v17  ;;  %264 = vmatpush1.bf16.msra.mxu0 %v797_v20  ;;  %v28_v40 = vadd.s32 16, %v26_v10  ;;  %v89_v43 = vsel %vm84_vm1, %v86_v18, %v88_v34  ;;  %736 = vmatpush3.bf16.msra.mxu1 %v809_v48  ;;  %v802_v58 = vld [vmem:[%s1074_s1 + $0x30] sm:$0xff]   ;;  %v803_v59 = vld [vmem:[%s1074_s1 + $0x38] sm:$0xff]   ;;  %v804_v60 = vld [vmem:[%s1074_s1 + $0x40] sm:$0xff]  }
   0x8   :  { %137 = vrot.lane.b32.xlu0 %v132_v14, %s833_s26  ;;  %265 = vmatprep.subr.bf16.mxu0 %v832_v4  ;;  %vm907_vm5 = vcmp.eq.s32.totalorder %v34_v24, 0  ;;  %v90_v45 = vsel %vm84_vm1, %v88_v34, %v79_v11  ;;  %v805_v61 = vld [vmem:[%s1074_s1 + $0x48] sm:$0xff]   ;;  %v806_v62 = vld [vmem:[%s1074_s1 + $0x50] sm:$0xff]   ;;  %v807_v63 = vld [vmem:[%s1074_s1 + $0x58] sm:$0xff]  }
   0x9   :  { %vm889_vm2 = vcmp.eq.s32.totalorder %v41_v21, 15  ;;  %vm893_vm3 = vcmp.eq.s32.totalorder %v55_v22, 15  ;;  %v114_v38 = vsel %vm907_vm5, 0.0, %v95_v30  ;;  %v48_v42 = vand.u32 15, %v28_v40  ;;  %737 = vmatprep.subr.bf16.mxu1 %v810_v50  ;;  %v815_v6 = vld [vmem:[%s1075_s3 + $0x18] sm:$0xff]   ;;  %v817_v7 = vld [vmem:[%s1075_s3 + $0x20] sm:$0xff]   ;;  %vm719_vm8 = vmneg %vm907_vm5 }
   0xa   :  { %v123_v31 = vsel %vm889_vm2, 0.0, %v101_v19  ;;  %v125_v32 = vsel %vm893_vm3, 0.0, %v109_v23  ;;  %v126_v39 = vpack.c.bf16 %v87_v33, %v114_v38  ;;  %v818_v8 = vld [vmem:[%s1075_s3 + $0x68] sm:$0xff]   ;;  %v820_v10 = vld [vmem:[%s1075_s3 + $0x70] sm:$0xff]   ;;  %v822_v12 = vld [vmem:[%s1075_s3 + $0x78] sm:$0xff]  }
   0xb   :  { %v144_v35 = vpack.c.bf16 %v123_v31, %v99_v25  ;;  %v145_v36 = vpack.c.bf16 %v125_v32, %v103_v26  ;;  %266 = vmatpush1.bf16.msra.mxu0 %v798_v29  ;;  %vm928_vm6 = vcmp.eq.s32.totalorder %v48_v42, 0  ;;  %738 = vmatpush3.bf16.msra.mxu1 %v811_v52  ;;  %v819_v9 = vld [vmem:[%s1075_s3 + $0x28] sm:$0xff]   ;;  %v821_v11 = vld [vmem:[%s1075_s3 + $0x30] sm:$0xff]   ;;  %v823_v13 = vld [vmem:[%s1075_s3 + $0x38] sm:$0xff]  }
   0xc   :  { %267 = vmatprep.subr.bf16.mxu0 %v832_v4  ;;  %129 = vst.msk [vmem:[#allocation2] sm:$0xff] %vm128_vm4, %v126_v39  ;;  %v116_v49 = vsel %vm928_vm6, 0.0, %v89_v43  ;;  %739 = vmatprep.subr.bf16.mxu1 %v812_v54  ;;  %v824_v14 = vld [vmem:[%s1075_s3 + $0x80] sm:$0xff]   ;;  %vm720_vm10 = vmpackc.low %vm834_vm9, %vm719_vm8  ;;  %v829_v27 = vld [vmem:[%s1075_s3 + $0xa8] sm:$0xff]  }
   0xd   :  { %146 = vst.msk [vmem:[#allocation2 + $0x8] sm:$0xff] %vm128_vm4, %v144_v35  ;;  %147 = vst.msk [vmem:[#allocation2 + $0x18] sm:$0xff] %vm128_vm4, %v145_v36  ;;  %v127_v51 = vpack.c.bf16 %v90_v45, %v116_v49  ;;  %v679_v15 = vld [vmem:[%s1076_s2] ss:$0 sm:$0xff] }
   0xe   :  { %vm723_vm11 = vmneg %vm928_vm6  ;;  %v828_v47 = vld [vmem:[%s1075_s3 + $0xa0] sm:$0xff]  }
   0xf   :  { %268 = vmatpush1.bf16.msra.mxu0 %v799_v41  ;;  %130 = vst.msk [vmem:[#allocation2 + $0x10] sm:$0xff] %vm128_vm4, %v127_v51  ;;  %740 = vmatpush3.bf16.msra.mxu1 %v813_v56  ;;  %vm727_vm12 = vmneg %vm889_vm2  ;;  %v694_v28 = vld [vmem:[%s1077_s4] ss:$0 sm:$0xff] }
  0x10   :  { %269 = vmatprep.subr.bf16.mxu0 %v832_v4  ;;  %741 = vmatprep.subr.bf16.mxu1 %v814_v57  ;;  %vm724_vm13 = vmpackc.low %vm834_vm9, %vm723_vm11 }
  0x11   :  { %vm728_vm14 = vmpackc.low %vm727_vm12, %vm834_vm9 }
  0x12   :  { %vm731_vm15 = vmneg %vm893_vm3 }
  0x13   :  { %270 = vmatpush1.bf16.msra.mxu0 %v800_v44  ;;  %742 = vmatpush3.bf16.msra.mxu1 %v815_v6 }
  0x14   :  { %v149_v53 = vld [vmem:[#allocation2 + $0x8] sm:$0xff]  ;;  %271 = vmatprep.subr.bf16.mxu0 %v832_v4  ;;  %v151_v2 = vld [vmem:[#allocation2 + $0x18] sm:$0xff] }
  0x15   :  { %692 = vmatprep.mubr.msk.bf16.mxu0 %vm128_vm4, %v149_v53 }
  0x17   :  { %272 = vmatpush1.bf16.msra.mxu0 %v801_v55  ;;  %v825_v55 = vld [vmem:[%s1075_s3 + $0x88] sm:$0xff]  }
  0x18   :  { %273 = vmatprep.subr.bf16.mxu0 %v832_v4 }
  0x1b   :  { %274 = vmatpush1.bf16.msra.mxu0 %v802_v58  ;;  %v826_v58 = vld [vmem:[%s1075_s3 + $0x90] sm:$0xff]  }
  0x1c   :  { %275 = vmatprep.subr.bf16.mxu0 %v832_v4 }
  0x1f   :  { %276 = vmatpush1.bf16.msra.mxu0 %v803_v59  ;;  %v827_v59 = vld [vmem:[%s1075_s3 + $0x98] sm:$0xff]  }
  0x20   :  { %277 = vmatprep.subr.bf16.mxu0 %v832_v4 }
  0x23   :  { %278 = vmatpush1.bf16.msra.mxu0 %v804_v60  ;;  %v830_v60 = vld [vmem:[%s1075_s3 + $0xb0] sm:$0xff]  }
  0x24   :  { %279 = vmatprep.subr.bf16.mxu0 %v832_v4 }
  0x27   :  { %280 = vmatpush1.bf16.msra.mxu0 %v805_v61  ;;  %v831_v61 = vld [vmem:[%s1075_s3 + $0xb8] sm:$0xff]  }
  0x28   :  { %281 = vmatprep.subr.bf16.mxu0 %v832_v4 }
  0x2b   :  { %282 = vmatpush1.bf16.msra.mxu0 %v806_v62 }
  0x2c   :  { %283 = vmatprep.subr.bf16.mxu0 %v832_v4  ;;  %v816_v4 = vld [vmem:[%s1075_s3 + $0x60] sm:$0xff]  }
  0x2d   :  { %743 = vmatprep.subr.bf16.mxu1 %v816_v4 }
  0x2e   :  { %744 = vmatpush3.bf16.msra.mxu1 %v817_v7 }
  0x2f   :  { %284 = vmatpush1.bf16.msra.mxu0 %v807_v63  ;;  %745 = vmatprep.subr.bf16.mxu1 %v818_v8 }
  0x32   :  { %746 = vmatpush3.bf16.msra.mxu1 %v819_v9 }
  0x33   :  { %747 = vmatprep.subr.bf16.mxu1 %v820_v10 }
  0x36   :  { %748 = vmatpush3.bf16.msra.mxu1 %v821_v11 }
  0x37   :  { %749 = vmatprep.subr.bf16.mxu1 %v822_v12 }
  0x3a   :  { %750 = vmatpush3.bf16.msra.mxu1 %v823_v13 }
  0x3b   :  { %773 = vmatprep.subr.bf16.mxu1 %v824_v14 }
  0x76   :  { %v136_v0 = vpop.permute.xlu0 %135 }
  0x77   :  { %142 = vst.msk [vmem:[#allocation2] sm:$0xff] %vm141_vm7, %v136_v0 }
  0x7a   :  { %v138_v1 = vpop.permute.xlu0 %137 }
  0x7b   :  { %143 = vst.msk [vmem:[#allocation2 + $0x10] sm:$0xff] %vm141_vm7, %v138_v1 }
  0x7e   :  { %v148_v3 = vld [vmem:[#allocation2] sm:$0xff] }
  0x7f   :  { %294 = vmatmul.mubr.bf16.vlgmr.msra.gmra.mrb[0].mxu0 %v148_v3 }
  0x80   :  { %693 = vmatprep.mubr.msk.bf16.mxu0 %vm128_vm4, %v151_v2 }
  0x82   :  { %v150_v5 = vld [vmem:[#allocation2 + $0x10] sm:$0xff] }
  0x87   :  { %302 = vmatmul.mubr.bf16.gmra.mrb[4].mxu0 %v150_v5 }
 0x152   :  { %v295_v16 = vpop.f32.mrb[0].mxu0 }
 0x153   :  { %v296_v17 = vadd.f32 %v679_v15, %v295_v16  ;;  %v297_v18 = vpop.f32.mrb[1].mxu0 }
 0x154   :  { %v298_v19 = vpop.f32.mrb[2].mxu0 }
 0x155   :  { %v310_v20 = vmax.f32 %v296_v17, 0.0  ;;  %v299_v21 = vadd.f32 %v679_v15, %v298_v19  ;;  %v300_v22 = vpop.f32.mrb[3].mxu0 }
 0x157   :  { %v311_v23 = vmax.f32 %v299_v21, 0.0  ;;  %v320_v24 = vrot.slane %v310_v20, 7  ;;  %v331_v25 = vrot.slane %v310_v20, 1 }
 0x159   :  { %v321_v26 = vrot.slane %v311_v23, 7  ;;  %v332_v29 = vrot.slane %v311_v23, 1  ;;  %v356_v30 = vpack.c.bf16 %v311_v23, %v310_v20 }
 0x15a   :  { %v303_v31 = vpop.f32.mrb[4].mxu0 }
 0x15b   :  { %v304_v32 = vadd.f32 %v679_v15, %v303_v31  ;;  %v305_v33 = vpop.f32.mrb[5].mxu0  ;;  %601 = vmatprep.mubr.bf16.mxu1 %v356_v30  ;;  %v322_v34 = vsel %vm84_vm1, %v320_v24, %v321_v26  ;;  %v333_v35 = vsel %vm96_vm0, %v331_v25, %v332_v29 }
 0x15c   :  { %v306_v36 = vpop.f32.mrb[6].mxu0 }
 0x15d   :  { %v312_v38 = vmax.f32 %v304_v32, 0.0  ;;  %v307_v39 = vadd.f32 %v679_v15, %v306_v36  ;;  %v308_v40 = vpop.f32.mrb[7].mxu0 }
 0x15f   :  { %v323_v41 = vrot.slane %v312_v38, 7  ;;  %v334_v42 = vrot.slane %v312_v38, 1  ;;  %v313_v43 = vmax.f32 %v307_v39, 0.0 }
 0x161   :  { %v315_v44 = vrot.slane %v313_v43, 7  ;;  %v336_v45 = vrot.slane %v313_v43, 1  ;;  %v357_v46 = vpack.c.bf16 %v313_v43, %v312_v38  ;;  %v324_v48 = vsel %vm84_vm1, %v321_v26, %v323_v41 }
 0x162   :  { %v335_v49 = vsel %vm96_vm0, %v332_v29, %v334_v42 }
 0x163   :  { %v337_v50 = vsel %vm96_vm0, %v334_v42, %v336_v45  ;;  %v343_v51 = vsel %vm96_vm0, %v336_v45, %v331_v25  ;;  %v330_v52 = vsel %vm84_vm1, %v315_v44, %v320_v24  ;;  %v325_v53 = vsel %vm84_vm1, %v323_v41, %v315_v44  ;;  %vm732_vm0 = vmpackc.low %vm731_vm15, %vm834_vm9 }
 0x164   :  { %v733_v37 = vpack.c.bf16 %v343_v51, %v337_v50  ;;  %v721_v54 = vpack.c.bf16 %v322_v34, %v330_v52  ;;  %v725_v56 = vpack.c.bf16 %v325_v53, %v324_v48  ;;  %v729_v57 = vpack.c.bf16 %v335_v49, %v333_v35 }
 0x166   :  { %722 = vmatmul.mubr.msk.bf16.vlgmr.msra.gmra.mrb[0].mxu1 %vm720_vm10, %v721_v54 }
 0x167   :  { %774 = vmatpush3.bf16.msra.mxu1 %v824_v14  ;;  %609 = vmatprep.mubr.bf16.mxu1 %v357_v46 }
 0x168   :  { %775 = vmatprep.subr.bf16.mxu1 %v825_v55 }
 0x16b   :  { %776 = vmatpush3.bf16.msra.mxu1 %v825_v55 }
 0x16c   :  { %777 = vmatprep.subr.bf16.mxu1 %v826_v58 }
 0x16e   :  { %726 = vmatmul.mubr.msk.bf16.gmra.mrb[4].mxu1 %vm724_vm13, %v725_v56 }
 0x16f   :  { %778 = vmatpush3.bf16.msra.mxu1 %v826_v58  ;;  %789 = vmatprep.mubr.msk.bf16.mxu1 %vm728_vm14, %v729_v57 }
 0x170   :  { %779 = vmatprep.subr.bf16.mxu1 %v827_v59 }
 0x173   :  { %780 = vmatpush3.bf16.msra.mxu1 %v827_v59 }
 0x174   :  { %781 = vmatprep.subr.bf16.mxu1 %v828_v47 }
 0x177   :  { %782 = vmatpush3.bf16.msra.mxu1 %v828_v47 }
 0x178   :  { %783 = vmatprep.subr.bf16.mxu1 %v829_v27 }
 0x17b   :  { %784 = vmatpush3.bf16.msra.mxu1 %v829_v27 }
 0x17c   :  { %785 = vmatprep.subr.bf16.mxu1 %v830_v60 }
 0x17f   :  { %786 = vmatpush3.bf16.msra.mxu1 %v830_v60 }
 0x180   :  { %787 = vmatprep.subr.bf16.mxu1 %v831_v61 }
 0x183   :  { %788 = vmatpush3.bf16.msra.mxu1 %v831_v61 }
 0x186   :  { %790 = vmatmul.mubr.msk.bf16.vlgmr.msra.gmra.mrb[8].mxu1 %vm732_vm0, %v733_v37 }
 0x239   :  { %v751_v62 = vpop.f32.mrb[0].mxu1 }
 0x23a   :  { %v752_v63 = vpop.f32.mrb[1].mxu1 }
 0x23b   :  { %v753_v0 = vadd.f32 %v752_v63, %v751_v62  ;;  %v754_v1 = vpop.f32.mrb[2].mxu1 }
 0x23c   :  { %v755_v2 = vpop.f32.mrb[3].mxu1 }
 0x23d   :  { %v756_v3 = vadd.f32 %v755_v2, %v754_v1  ;;  %v604_v12 = vadd.f32 %v753_v0, %v694_v28 }
 0x23f   :  { %v607_v18 = vadd.f32 %v756_v3, %v694_v28 }
 0x241   :  { %v757_v5 = vpop.f32.mrb[4].mxu1 }
 0x242   :  { %v758_v6 = vpop.f32.mrb[5].mxu1 }
 0x243   :  { %v759_v4 = vadd.f32 %v758_v6, %v757_v5  ;;  %v760_v7 = vpop.f32.mrb[6].mxu1 }
 0x244   :  { %v761_v8 = vpop.f32.mrb[7].mxu1 }
 0x245   :  { %v762_v9 = vadd.f32 %v761_v8, %v760_v7  ;;  %v612_v10 = vadd.f32 %v759_v4, %v694_v28 }
 0x247   :  { %v615_v15 = vadd.f32 %v762_v9, %v694_v28 }
 0x259   :  { %v791_v11 = vpop.f32.mrb[8].mxu1 }
 0x25a   :  { %v661_v13 = vadd.f32 %v791_v11, %v612_v10  ;;  %v652_v14 = vpop.f32.mrb[9].mxu1 }
 0x25b   :  { %v653_v16 = vadd.f32 %v652_v14, %v604_v12  ;;  %v792_v17 = vpop.f32.mrb[10].mxu1 }
 0x25c   :  { %v669_v19 = vmax.f32 %v661_v13, 0.0  ;;  %v664_v20 = vadd.f32 %v792_v17, %v615_v15  ;;  %v655_v21 = vpop.f32.mrb[11].mxu1 }
 0x25d   :  { %v667_v22 = vmax.f32 %v653_v16, 0.0  ;;  %v656_v23 = vadd.f32 %v655_v21, %v607_v18 }
 0x25e   :  { %673 = vst [vmem:[%s1078_s5 + $0x10] sm:$0xff] %v669_v19  ;;  %v670_v24 = vmax.f32 %v664_v20, 0.0 }
 0x25f   :  { %671 = vst [vmem:[%s1078_s5] sm:$0xff] %v667_v22  ;;  %v668_v25 = vmax.f32 %v656_v23, 0.0 }
 0x260   :  { %674 = vst [vmem:[%s1078_s5 + $0x18] sm:$0xff] %v670_v24 }
 0x261   :  { %672 = vst [vmem:[%s1078_s5 + $0x8] sm:$0xff] %v668_v25 }

</bundles_post_ra>
